<compile_context>
chip_gen: v6e
topology: v6e:2x2x1
jax: 0.10.0
libtpu: 0.0.40
codegen_flags: <defaults>
</compile_context>

<pallas_src>
import math
from functools import partial

import numpy as np
import jax
import jax.numpy as jnp
from jax import lax
from jax.experimental import pallas as pl
from jax.experimental.pallas import tpu as pltpu


# ---------------------------------------------------------------------------
# Host-side constants
# ---------------------------------------------------------------------------
def bilinear_up2_matrix(n):
    """(2n, n) matrix implementing F.interpolate(scale_factor=2, 'bilinear',
    align_corners=False) along one axis (half-pixel convention, clamped)."""
    m = np.zeros((2 * n, n), np.float32)
    for o in range(2 * n):
        coord = max((o + 0.5) / 2.0 - 0.5, 0.0)
        i0 = min(int(np.floor(coord)), n - 1)
        i1 = min(i0 + 1, n - 1)
        frac = coord - i0
        m[o, i0] += 1.0 - frac
        m[o, i1] += frac
    return m


# ---------------------------------------------------------------------------
# Pallas kernel (one grid step = one (batch, output-row-tile))
# ---------------------------------------------------------------------------
def _fused_kernel(x_ref, uh_ref, g_ref, b_ref, o_ref, s_ref, *,
                  ksize, h, activate, negative_slope, act_scale):
    """
    x_ref : (1, H, W*Cin)      original-resolution input (NHWC, lanes = W*Cin)
    uh_ref: (1, TR, K*H)       row upsample+pad+kh-shift packed along K*H, per tile
    g_ref : (K, W*Cin, Npad)   width upsample + pad + kw folded conv weight
    b_ref : (1, Npad)          bias broadcast over flattened (ow, co) lanes
    o_ref : (1, TR, Npad)      lane-dense output tile ((ow, co) flattened)
    s_ref : (K*H, Npad)        VMEM scratch: per-batch cache of x @ G[kh]
    """
    # ---- stage 1: expensive contraction over W*Cin, ONCE per batch image ----
    @pl.when(pl.program_id(1) == 0)
    def _():
        xf = x_ref[0]                                   # (H, W*Cin)
        for kh in range(ksize):                         # static unroll (K taps)
            s_kh = jnp.dot(xf, g_ref[kh], preferred_element_type=jnp.float32)
            s_ref[pl.ds(kh * h, h), :] = s_kh.astype(s_ref.dtype)

    # ---- stage 2: one packed MXU matmul per row tile (contraction K*H) ----
    acc = jnp.dot(uh_ref[0], s_ref[...], preferred_element_type=jnp.float32)
    acc = acc + b_ref[...]                              # (1, Npad) broadcast
    if activate:  # fused leaky relu: leaky(x + b) * sqrt(2)
        acc = jnp.where(acc >= 0.0, acc, negative_slope * acc) * act_scale
    o_ref[0] = acc.astype(o_ref.dtype)


# ---------------------------------------------------------------------------
# Wrapper
# ---------------------------------------------------------------------------
def _pick_row_tile(ho, max_rows=128):
    """Largest row tile (preferring sublane-aligned divisors) up to max_rows."""
    if max_rows is None or ho <= max_rows:
        return ho
    best_any = None
    for cand in range(max_rows, 0, -1):
        if ho % cand == 0:
            if cand % 8 == 0:
                return cand
            if best_any is None:
                best_any = cand
    return best_any if best_any is not None else ho


def conv_up_layer_forward(x_nchw, weight, act_bias, *, stride=1, padding=1,
                          activate=True, negative_slope=0.2,
                          compute_dtype=jnp.bfloat16, out_dtype=jnp.float32,
                          max_row_tile=128):
    # TODO(synk): stride != 1 not implemented (GFPGAN ConvUpLayer uses stride=1).
    assert stride == 1
    b, cin, h, w = x_nchw.shape
    cout, cin_w, k, k2 = weight.shape
    assert cin_w == cin and k == k2
    scale = 1.0 / math.sqrt(cin * k * k)

    ho = 2 * h + 2 * padding - k + 1
    wo = 2 * w + 2 * padding - k + 1
    assert ho > 0 and wo > 0

    # ---- host-side constant folding (interp-matrix / weight sized, once) ----
    uh = bilinear_up2_matrix(h)                                   # (2H, H)
    uw = bilinear_up2_matrix(w)                                   # (2W, W)
    uh_pad = np.zeros((2 * h + 2 * padding, h), np.float32)
    uh_pad[padding:padding + 2 * h] = uh
    uw_pad = np.zeros((2 * w + 2 * padding, w), np.float32)
    uw_pad[padding:padding + 2 * w] = uw

    # Fold width upsample + zero pad + kw conv taps into the conv weight:
    #   G[kh, w, ci, ow, co] = sum_kw Wsc[co,ci,kh,kw] * Uw_pad[ow+kw, w]
    # TODO(synk): dense in (w, ow) -> switch to banded 2-parity folding for
    #             production-scale widths (see header TODO).
    uw_shift = np.stack([uw_pad[l:l + wo, :] for l in range(k)], axis=0)  # (K,Wo,W)
    g = jnp.einsum('oikl,lqw->kwiqo',
                   weight.astype(jnp.float32) * scale,
                   jnp.asarray(uw_shift))                 # (K, W, Cin, Wo, Cout)
    g = g.reshape(k, w * cin, wo * cout)

    # Lane-dense output: pad the flattened (ow, co) lanes to a multiple of 128.
    n_out = wo * cout
    n_pad = ((n_out + 127) // 128) * 128
    if n_pad != n_out:
        g = jnp.pad(g, ((0, 0), (0, 0), (0, n_pad - n_out)))
    bias_flat = jnp.tile(act_bias.astype(jnp.float32), wo)        # (Wo*Cout,)
    if n_pad != n_out:
        bias_flat = jnp.pad(bias_flat, (0, n_pad - n_out))
    bias_flat = bias_flat.reshape(1, n_pad)

    # Height upsample + zero pad + kh shift, packed along the contraction dim
    # (TR, K*H) per row tile so the kernel needs ONE matmul per tile.
    tr = _pick_row_tile(ho, max_row_tile)
    n_tiles = ho // tr
    uh_packed = np.zeros((n_tiles, tr, k * h), np.float32)
    for t in range(n_tiles):
        for kh in range(k):
            uh_packed[t, :, kh * h:(kh + 1) * h] = \
                uh_pad[t * tr + kh: t * tr + kh + tr, :]

    # Original-resolution input as NHWC with (W, Cin) flattened onto lanes.
    x_flat = (x_nchw.astype(jnp.float32)
              .transpose(0, 2, 3, 1).reshape(b, h, w * cin))

    # bf16 MXU inputs by default (f32 accumulation inside the kernel).
    x_flat = x_flat.astype(compute_dtype)
    g = g.astype(compute_dtype)
    uh_j = jnp.asarray(uh_packed, dtype=compute_dtype)

    kernel = partial(_fused_kernel, ksize=k, h=h, activate=activate,
                     negative_slope=negative_slope, act_scale=math.sqrt(2.0))

    def _call(single_buffer_invariants):
        # Grid-invariant operands (G, bias) should not be double-buffered; this
        # matters for VMEM on v7x.  Fallback path keeps default buffering if
        # pipeline_mode / Buffered(1) is unsupported by the installed JAX.
        inv = dict(pipeline_mode=pl.Buffered(1)) if single_buffer_invariants else {}
        in_specs = [
            pl.BlockSpec((1, h, w * cin), lambda bi, ti: (bi, 0, 0)),
            pl.BlockSpec((1, tr, k * h), lambda bi, ti: (ti, 0, 0)),
            pl.BlockSpec((k, w * cin, n_pad), lambda bi, ti: (0, 0, 0), **inv),
            pl.BlockSpec((1, n_pad), lambda bi, ti: (0, 0), **inv),
        ]
        return pl.pallas_call(
            kernel,
            grid=(b, n_tiles),
            in_specs=in_specs,
            out_specs=pl.BlockSpec((1, tr, n_pad), lambda bi, ti: (bi, ti, 0)),
            out_shape=jax.ShapeDtypeStruct((b, ho, n_pad), out_dtype),
            scratch_shapes=[pltpu.VMEM((k * h, n_pad), compute_dtype)],
            compiler_params=pltpu.CompilerParams(
                dimension_semantics=("parallel", "arbitrary")),
        )(x_flat, uh_j, g, bias_flat)

    try:
        out_flat = _call(True)
    except Exception:
        out_flat = _call(False)

    out = out_flat[:, :, :n_out].reshape(b, ho, wo, cout)
    return out.transpose(0, 3, 1, 2)                              # back to NCHW


# ---------------------------------------------------------------------------
# Pure-JAX reference (correctness check of the Pallas path)
# ---------------------------------------------------------------------------
def reference_forward(x_nchw, weight, act_bias, *, padding=1,
                      negative_slope=0.2, activate=True):
    b, cin, h, w = x_nchw.shape
    cout, _, k, _ = weight.shape
    scale = 1.0 / math.sqrt(cin * k * k)
    up_h = jnp.asarray(bilinear_up2_matrix(h))
    up_w = jnp.asarray(bilinear_up2_matrix(w))
    x32 = x_nchw.astype(jnp.float32)
    up = jnp.einsum('ph,bchw->bcpw', up_h, x32)
    up = jnp.einsum('qw,bcpw->bcpq', up_w, up)
    out = lax.conv_general_dilated(
        up, weight.astype(jnp.float32) * scale, window_strides=(1, 1),
        padding=((padding, padding), (padding, padding)),
        dimension_numbers=('NCHW', 'OIHW', 'NCHW'),
        precision=lax.Precision.HIGHEST)
    out = out + act_bias[None, :, None, None]
    if activate:
        out = jnp.where(out >= 0.0, out, negative_slope * out) * math.sqrt(2.0)
    return out


if __name__ == "__main__":
    key = jax.random.PRNGKey(0)
    kx, kw_, kb = jax.random.split(key, 3)

    B, Cin, Cout, H, W, K = 2, 4, 8, 16, 16, 3
    x = jax.random.normal(kx, (B, Cin, H, W), dtype=jnp.float32)
    # ConvUpLayer.__init__: weight = torch.randn(Cout, Cin, K, K)
    weight = jax.random.normal(kw_, (Cout, Cin, K, K), dtype=jnp.float32)
    # FusedLeakyReLU bias (learnable; nonzero here to exercise the bias path)
    act_bias = 0.1 * jax.random.normal(kb, (Cout,), dtype=jnp.float32)

    ref = reference_forward(x, weight, act_bias, padding=1, activate=True)

    # Default fast path: bf16 MXU inputs, f32 accumulation, whole-image row tile.
    out = conv_up_layer_forward(x, weight, act_bias, stride=1, padding=1,
                                activate=True)
    out = jax.block_until_ready(out)
    assert out.shape == (B, Cout, 2 * H, 2 * W)
    np.testing.assert_allclose(np.asarray(out), np.asarray(ref),
                               rtol=5e-2, atol=5e-2)

    # Exact-semantics f32 path, forced small row tile to exercise the
    # multi-tile / per-batch s-cache ("arbitrary" axis) scheduling.
    out32 = conv_up_layer_forward(x, weight, act_bias, stride=1, padding=1,
                                  activate=True, compute_dtype=jnp.float32,
                                  max_row_tile=8)
    out32 = jax.block_until_ready(out32)
    np.testing.assert_allclose(np.asarray(out32), np.asarray(ref),
                               rtol=2e-3, atol=2e-3)

    print("KERNEL_OK")
</pallas_src>

<mosaic_0001>
module attributes {stable_mosaic.version = 11 : i64} {
  func.func @_fused_kernel(%arg0: i32, %arg1: i32, %arg2: memref<1x16x64xbf16, #tpu.memory_space<vmem>>, %arg3: memref<1x32x48xbf16, #tpu.memory_space<vmem>>, %arg4: memref<3x64x256xbf16, #tpu.memory_space<vmem>>, %arg5: memref<1x256xf32, #tpu.memory_space<vmem>>, %arg6: memref<1x32x256xf32, #tpu.memory_space<vmem>>, %arg7: memref<48x256xbf16, #tpu.memory_space<vmem>>) attributes {dimension_semantics = [#tpu.dimension_semantics<parallel>, #tpu.dimension_semantics<arbitrary>], iteration_bounds = array<i64: 2, 1>, scalar_prefetch = 0 : i64, scratch_operands = 1 : i64, tpu.core_type = #tpu.core_type<tc>, window_params = [{transform_indices = @transform_0, window_bounds = array<i64: 1, 16, 64>}, {transform_indices = @transform_1, window_bounds = array<i64: 1, 32, 48>}, {pipeline_mode = #tpu.pipeline_mode<synchronous>, transform_indices = @transform_2, window_bounds = array<i64: 3, 64, 256>}, {pipeline_mode = #tpu.pipeline_mode<synchronous>, transform_indices = @transform_3, window_bounds = array<i64: 1, 256>}, {transform_indices = @transform_4, window_bounds = array<i64: 1, 32, 256>}]} {
    %c0_i32 = arith.constant 0 : i32
    %0 = arith.cmpi eq, %arg1, %c0_i32 : i32
    %1 = arith.extui %0 : i1 to i32
    %c0_i32_0 = arith.constant 0 : i32
    %2 = arith.cmpi ne, %1, %c0_i32_0 : i32
    scf.if %2 {
      %c0_13 = arith.constant 0 : index
      %c0_14 = arith.constant 0 : index
      %c0_15 = arith.constant 0 : index
      %20 = vector.load %arg2[%c0_13, %c0_14, %c0_15] : memref<1x16x64xbf16, #tpu.memory_space<vmem>>, vector<1x16x64xbf16>
      %21 = vector.shape_cast %20 : vector<1x16x64xbf16> to vector<16x64xbf16>
      %c0_16 = arith.constant 0 : index
      %c0_17 = arith.constant 0 : index
      %c0_18 = arith.constant 0 : index
      %22 = vector.load %arg4[%c0_16, %c0_17, %c0_18] : memref<3x64x256xbf16, #tpu.memory_space<vmem>>, vector<1x64x256xbf16>
      %23 = vector.shape_cast %22 : vector<1x64x256xbf16> to vector<64x256xbf16>
      %cst_19 = arith.constant dense<0.000000e+00> : vector<16x256xf32>
      %24 = tpu.matmul %21, %23, %cst_19 {dimension_numbers = #tpu.dot_dimension_numbers<[1], [0], [0], [1], [0, 0, 1, 1], [], []>} : vector<16x64xbf16>, vector<64x256xbf16>, vector<16x256xf32> -> vector<16x256xf32>
      %25 = arith.truncf %24 : vector<16x256xf32> to vector<16x256xbf16>
      %c0_20 = arith.constant 0 : index
      %c0_21 = arith.constant 0 : index
      %26 = vector.load %arg7[%c0_20, %c0_21] : memref<48x256xbf16, #tpu.memory_space<vmem>>, vector<16x256xbf16>
      tpu.vector_store %arg7[%c0_20, %c0_21], %25 {strides = array<i32>} : memref<48x256xbf16, #tpu.memory_space<vmem>>, vector<16x256xbf16>,
      %c1 = arith.constant 1 : index
      %c0_22 = arith.constant 0 : index
      %c0_23 = arith.constant 0 : index
      %27 = vector.load %arg4[%c1, %c0_22, %c0_23] : memref<3x64x256xbf16, #tpu.memory_space<vmem>>, vector<1x64x256xbf16>
      %28 = vector.shape_cast %27 : vector<1x64x256xbf16> to vector<64x256xbf16>
      %cst_24 = arith.constant dense<0.000000e+00> : vector<16x256xf32>
      %29 = tpu.matmul %21, %28, %cst_24 {dimension_numbers = #tpu.dot_dimension_numbers<[1], [0], [0], [1], [0, 0, 1, 1], [], []>} : vector<16x64xbf16>, vector<64x256xbf16>, vector<16x256xf32> -> vector<16x256xf32>
      %30 = arith.truncf %29 : vector<16x256xf32> to vector<16x256xbf16>
      %c16 = arith.constant 16 : index
      %c0_25 = arith.constant 0 : index
      %31 = vector.load %arg7[%c16, %c0_25] : memref<48x256xbf16, #tpu.memory_space<vmem>>, vector<16x256xbf16>
      tpu.vector_store %arg7[%c16, %c0_25], %30 {strides = array<i32>} : memref<48x256xbf16, #tpu.memory_space<vmem>>, vector<16x256xbf16>,
      %c2 = arith.constant 2 : index
      %c0_26 = arith.constant 0 : index
      %c0_27 = arith.constant 0 : index
      %32 = vector.load %arg4[%c2, %c0_26, %c0_27] : memref<3x64x256xbf16, #tpu.memory_space<vmem>>, vector<1x64x256xbf16>
      %33 = vector.shape_cast %32 : vector<1x64x256xbf16> to vector<64x256xbf16>
      %cst_28 = arith.constant dense<0.000000e+00> : vector<16x256xf32>
      %34 = tpu.matmul %21, %33, %cst_28 {dimension_numbers = #tpu.dot_dimension_numbers<[1], [0], [0], [1], [0, 0, 1, 1], [], []>} : vector<16x64xbf16>, vector<64x256xbf16>, vector<16x256xf32> -> vector<16x256xf32>
      %35 = arith.truncf %34 : vector<16x256xf32> to vector<16x256xbf16>
      %c32 = arith.constant 32 : index
      %c0_29 = arith.constant 0 : index
      %36 = vector.load %arg7[%c32, %c0_29] : memref<48x256xbf16, #tpu.memory_space<vmem>>, vector<16x256xbf16>
      tpu.vector_store %arg7[%c32, %c0_29], %35 {strides = array<i32>} : memref<48x256xbf16, #tpu.memory_space<vmem>>, vector<16x256xbf16>,
    } else {
    }
    %c0 = arith.constant 0 : index
    %c0_1 = arith.constant 0 : index
    %c0_2 = arith.constant 0 : index
    %3 = vector.load %arg3[%c0, %c0_1, %c0_2] : memref<1x32x48xbf16, #tpu.memory_space<vmem>>, vector<1x32x48xbf16>
    %4 = vector.shape_cast %3 : vector<1x32x48xbf16> to vector<32x48xbf16>
    %c0_3 = arith.constant 0 : index
    %c0_4 = arith.constant 0 : index
    %5 = vector.load %arg7[%c0_3, %c0_4] : memref<48x256xbf16, #tpu.memory_space<vmem>>, vector<48x256xbf16>
    %cst = arith.constant dense<0.000000e+00> : vector<32x256xf32>
    %6 = tpu.matmul %4, %5, %cst {dimension_numbers = #tpu.dot_dimension_numbers<[1], [0], [0], [1], [0, 0, 1, 1], [], []>} : vector<32x48xbf16>, vector<48x256xbf16>, vector<32x256xf32> -> vector<32x256xf32>
    %c0_5 = arith.constant 0 : index
    %c0_6 = arith.constant 0 : index
    %7 = vector.load %arg5[%c0_5, %c0_6] : memref<1x256xf32, #tpu.memory_space<vmem>>, vector<1x256xf32>
    %8 = vector.broadcast %7 : vector<1x256xf32> to vector<32x256xf32>
    %9 = arith.addf %6, %8 : vector<32x256xf32>
    %cst_7 = arith.constant 0.000000e+00 : f32
    %10 = vector.broadcast %cst_7 : f32 to vector<32x256xf32>
    %11 = arith.cmpf oge, %9, %10 : vector<32x256xf32>
    %cst_8 = arith.constant 2.000000e-01 : f32
    %12 = vector.broadcast %cst_8 : f32 to vector<32x256xf32>
    %13 = arith.mulf %12, %9 : vector<32x256xf32>
    %14 = arith.select %11, %9, %13 : vector<32x256xi1>, vector<32x256xf32>
    %cst_9 = arith.constant 1.41421354 : f32
    %15 = vector.broadcast %cst_9 : f32 to vector<32x256xf32>
    %16 = arith.mulf %14, %15 : vector<32x256xf32>
    %c0_10 = arith.constant 0 : index
    %c0_11 = arith.constant 0 : index
    %c0_12 = arith.constant 0 : index
    %17 = vector.load %arg6[%c0_10, %c0_11, %c0_12] : memref<1x32x256xf32, #tpu.memory_space<vmem>>, vector<1x32x256xf32>
    %18 = vector.shape_cast %17 : vector<1x32x256xf32> to vector<32x256xf32>
    %19 = vector.shape_cast %16 : vector<32x256xf32> to vector<1x32x256xf32>
    tpu.vector_store %arg6[%c0_10, %c0_11, %c0_12], %19 {strides = array<i32>} : memref<1x32x256xf32, #tpu.memory_space<vmem>>, vector<1x32x256xf32>,
    return
  }
  func.func @transform_0(%arg0: i32, %arg1: i32) -> (i32, i32, i32) {
    %c0_i32 = arith.constant 0 : i32
    %c0_i32_0 = arith.constant 0 : i32
    %c0_i32_1 = arith.constant 0 : i32
    return %arg0, %c0_i32, %c0_i32_0 : i32, i32, i32
  }
  func.func @transform_1(%arg0: i32, %arg1: i32) -> (i32, i32, i32) {
    %c0_i32 = arith.constant 0 : i32
    %c0_i32_0 = arith.constant 0 : i32
    %c0_i32_1 = arith.constant 0 : i32
    return %arg1, %c0_i32, %c0_i32_0 : i32, i32, i32
  }
  func.func @transform_2(%arg0: i32, %arg1: i32) -> (i32, i32, i32) {
    %c0_i32 = arith.constant 0 : i32
    %c0_i32_0 = arith.constant 0 : i32
    %c0_i32_1 = arith.constant 0 : i32
    %c0_i32_2 = arith.constant 0 : i32
    return %c0_i32, %c0_i32_0, %c0_i32_1 : i32, i32, i32
  }
  func.func @transform_3(%arg0: i32, %arg1: i32) -> (i32, i32) {
    %c0_i32 = arith.constant 0 : i32
    %c0_i32_0 = arith.constant 0 : i32
    %c0_i32_1 = arith.constant 0 : i32
    return %c0_i32, %c0_i32_0 : i32, i32
  }
  func.func @transform_4(%arg0: i32, %arg1: i32) -> (i32, i32, i32) {
    %c0_i32 = arith.constant 0 : i32
    %c0_i32_0 = arith.constant 0 : i32
    return %arg0, %arg1, %c0_i32 : i32, i32, i32
  }
}

module attributes {stable_mosaic.version = 11 : i64} {
  func.func @_fused_kernel(%arg0: i32, %arg1: i32, %arg2: memref<1x16x64xbf16, #tpu.memory_space<vmem>>, %arg3: memref<1x32x48xbf16, #tpu.memory_space<vmem>>, %arg4: memref<3x64x256xbf16, #tpu.memory_space<vmem>>, %arg5: memref<1x256xf32, #tpu.memory_space<vmem>>, %arg6: memref<1x32x256xf32, #tpu.memory_space<vmem>>, %arg7: memref<48x256xbf16, #tpu.memory_space<vmem>>) attributes {dimension_semantics = [#tpu.dimension_semantics<parallel>, #tpu.dimension_semantics<arbitrary>], iteration_bounds = array<i64: 2, 1>, scalar_prefetch = 0 : i64, scratch_operands = 1 : i64, tpu.core_type = #tpu.core_type<tc>, window_params = [{transform_indices = @transform_0, window_bounds = array<i64: 1, 16, 64>}, {transform_indices = @transform_1, window_bounds = array<i64: 1, 32, 48>}, {pipeline_mode = #tpu.pipeline_mode<synchronous>, transform_indices = @transform_2, window_bounds = array<i64: 3, 64, 256>}, {pipeline_mode = #tpu.pipeline_mode<synchronous>, transform_indices = @transform_3, window_bounds = array<i64: 1, 256>}, {transform_indices = @transform_4, window_bounds = array<i64: 1, 32, 256>}]} {
    %c0_i32 = arith.constant 0 : i32
    %0 = arith.cmpi eq, %arg1, %c0_i32 : i32
    %1 = arith.extui %0 : i1 to i32
    %c0_i32_0 = arith.constant 0 : i32
    %2 = arith.cmpi ne, %1, %c0_i32_0 : i32
    scf.if %2 {
      %c0_13 = arith.constant 0 : index
      %c0_14 = arith.constant 0 : index
      %c0_15 = arith.constant 0 : index
      %20 = vector.load %arg2[%c0_13, %c0_14, %c0_15] : memref<1x16x64xbf16, #tpu.memory_space<vmem>>, vector<1x16x64xbf16>
      %21 = vector.shape_cast %20 : vector<1x16x64xbf16> to vector<16x64xbf16>
      %c0_16 = arith.constant 0 : index
      %c0_17 = arith.constant 0 : index
      %c0_18 = arith.constant 0 : index
      %22 = vector.load %arg4[%c0_16, %c0_17, %c0_18] : memref<3x64x256xbf16, #tpu.memory_space<vmem>>, vector<1x64x256xbf16>
      %23 = vector.shape_cast %22 : vector<1x64x256xbf16> to vector<64x256xbf16>
      %cst_19 = arith.constant dense<0.000000e+00> : vector<16x256xf32>
      %24 = tpu.matmul %21, %23, %cst_19 {dimension_numbers = #tpu.dot_dimension_numbers<[1], [0], [0], [1], [0, 0, 1, 1], [], []>} : vector<16x64xbf16>, vector<64x256xbf16>, vector<16x256xf32> -> vector<16x256xf32>
      %25 = arith.truncf %24 : vector<16x256xf32> to vector<16x256xbf16>
      %c0_20 = arith.constant 0 : index
      %c0_21 = arith.constant 0 : index
      %26 = vector.load %arg7[%c0_20, %c0_21] : memref<48x256xbf16, #tpu.memory_space<vmem>>, vector<16x256xbf16>
      tpu.vector_store %arg7[%c0_20, %c0_21], %25 {strides = array<i32>} : memref<48x256xbf16, #tpu.memory_space<vmem>>, vector<16x256xbf16>,
      %c1 = arith.constant 1 : index
      %c0_22 = arith.constant 0 : index
      %c0_23 = arith.constant 0 : index
      %27 = vector.load %arg4[%c1, %c0_22, %c0_23] : memref<3x64x256xbf16, #tpu.memory_space<vmem>>, vector<1x64x256xbf16>
      %28 = vector.shape_cast %27 : vector<1x64x256xbf16> to vector<64x256xbf16>
      %cst_24 = arith.constant dense<0.000000e+00> : vector<16x256xf32>
      %29 = tpu.matmul %21, %28, %cst_24 {dimension_numbers = #tpu.dot_dimension_numbers<[1], [0], [0], [1], [0, 0, 1, 1], [], []>} : vector<16x64xbf16>, vector<64x256xbf16>, vector<16x256xf32> -> vector<16x256xf32>
      %30 = arith.truncf %29 : vector<16x256xf32> to vector<16x256xbf16>
      %c16 = arith.constant 16 : index
      %c0_25 = arith.constant 0 : index
      %31 = vector.load %arg7[%c16, %c0_25] : memref<48x256xbf16, #tpu.memory_space<vmem>>, vector<16x256xbf16>
      tpu.vector_store %arg7[%c16, %c0_25], %30 {strides = array<i32>} : memref<48x256xbf16, #tpu.memory_space<vmem>>, vector<16x256xbf16>,
      %c2 = arith.constant 2 : index
      %c0_26 = arith.constant 0 : index
      %c0_27 = arith.constant 0 : index
      %32 = vector.load %arg4[%c2, %c0_26, %c0_27] : memref<3x64x256xbf16, #tpu.memory_space<vmem>>, vector<1x64x256xbf16>
      %33 = vector.shape_cast %32 : vector<1x64x256xbf16> to vector<64x256xbf16>
      %cst_28 = arith.constant dense<0.000000e+00> : vector<16x256xf32>
      %34 = tpu.matmul %21, %33, %cst_28 {dimension_numbers = #tpu.dot_dimension_numbers<[1], [0], [0], [1], [0, 0, 1, 1], [], []>} : vector<16x64xbf16>, vector<64x256xbf16>, vector<16x256xf32> -> vector<16x256xf32>
      %35 = arith.truncf %34 : vector<16x256xf32> to vector<16x256xbf16>
      %c32 = arith.constant 32 : index
      %c0_29 = arith.constant 0 : index
      %36 = vector.load %arg7[%c32, %c0_29] : memref<48x256xbf16, #tpu.memory_space<vmem>>, vector<16x256xbf16>
      tpu.vector_store %arg7[%c32, %c0_29], %35 {strides = array<i32>} : memref<48x256xbf16, #tpu.memory_space<vmem>>, vector<16x256xbf16>,
    } else {
    }
    %c0 = arith.constant 0 : index
    %c0_1 = arith.constant 0 : index
    %c0_2 = arith.constant 0 : index
    %3 = vector.load %arg3[%c0, %c0_1, %c0_2] : memref<1x32x48xbf16, #tpu.memory_space<vmem>>, vector<1x32x48xbf16>
    %4 = vector.shape_cast %3 : vector<1x32x48xbf16> to vector<32x48xbf16>
    %c0_3 = arith.constant 0 : index
    %c0_4 = arith.constant 0 : index
    %5 = vector.load %arg7[%c0_3, %c0_4] : memref<48x256xbf16, #tpu.memory_space<vmem>>, vector<48x256xbf16>
    %cst = arith.constant dense<0.000000e+00> : vector<32x256xf32>
    %6 = tpu.matmul %4, %5, %cst {dimension_numbers = #tpu.dot_dimension_numbers<[1], [0], [0], [1], [0, 0, 1, 1], [], []>} : vector<32x48xbf16>, vector<48x256xbf16>, vector<32x256xf32> -> vector<32x256xf32>
    %c0_5 = arith.constant 0 : index
    %c0_6 = arith.constant 0 : index
    %7 = vector.load %arg5[%c0_5, %c0_6] : memref<1x256xf32, #tpu.memory_space<vmem>>, vector<1x256xf32>
    %8 = vector.broadcast %7 : vector<1x256xf32> to vector<32x256xf32>
    %9 = arith.addf %6, %8 : vector<32x256xf32>
    %cst_7 = arith.constant 0.000000e+00 : f32
    %10 = vector.broadcast %cst_7 : f32 to vector<32x256xf32>
    %11 = arith.cmpf oge, %9, %10 : vector<32x256xf32>
    %cst_8 = arith.constant 2.000000e-01 : f32
    %12 = vector.broadcast %cst_8 : f32 to vector<32x256xf32>
    %13 = arith.mulf %12, %9 : vector<32x256xf32>
    %14 = arith.select %11, %9, %13 : vector<32x256xi1>, vector<32x256xf32>
    %cst_9 = arith.constant 1.41421354 : f32
    %15 = vector.broadcast %cst_9 : f32 to vector<32x256xf32>
    %16 = arith.mulf %14, %15 : vector<32x256xf32>
    %c0_10 = arith.constant 0 : index
    %c0_11 = arith.constant 0 : index
    %c0_12 = arith.constant 0 : index
    %17 = vector.load %arg6[%c0_10, %c0_11, %c0_12] : memref<1x32x256xf32, #tpu.memory_space<vmem>>, vector<1x32x256xf32>
    %18 = vector.shape_cast %17 : vector<1x32x256xf32> to vector<32x256xf32>
    %19 = vector.shape_cast %16 : vector<32x256xf32> to vector<1x32x256xf32>
    tpu.vector_store %arg6[%c0_10, %c0_11, %c0_12], %19 {strides = array<i32>} : memref<1x32x256xf32, #tpu.memory_space<vmem>>, vector<1x32x256xf32>,
    return
  }
  func.func @transform_0(%arg0: i32, %arg1: i32) -> (i32, i32, i32) {
    %c0_i32 = arith.constant 0 : i32
    %c0_i32_0 = arith.constant 0 : i32
    %c0_i32_1 = arith.constant 0 : i32
    return %arg0, %c0_i32, %c0_i32_0 : i32, i32, i32
  }
  func.func @transform_1(%arg0: i32, %arg1: i32) -> (i32, i32, i32) {
    %c0_i32 = arith.constant 0 : i32
    %c0_i32_0 = arith.constant 0 : i32
    %c0_i32_1 = arith.constant 0 : i32
    return %arg1, %c0_i32, %c0_i32_0 : i32, i32, i32
  }
  func.func @transform_2(%arg0: i32, %arg1: i32) -> (i32, i32, i32) {
    %c0_i32 = arith.constant 0 : i32
    %c0_i32_0 = arith.constant 0 : i32
    %c0_i32_1 = arith.constant 0 : i32
    %c0_i32_2 = arith.constant 0 : i32
    return %c0_i32, %c0_i32_0, %c0_i32_1 : i32, i32, i32
  }
  func.func @transform_3(%arg0: i32, %arg1: i32) -> (i32, i32) {
    %c0_i32 = arith.constant 0 : i32
    %c0_i32_0 = arith.constant 0 : i32
    %c0_i32_1 = arith.constant 0 : i32
    return %c0_i32, %c0_i32_0 : i32, i32
  }
  func.func @transform_4(%arg0: i32, %arg1: i32) -> (i32, i32, i32) {
    %c0_i32 = arith.constant 0 : i32
    %c0_i32_0 = arith.constant 0 : i32
    return %arg0, %arg1, %c0_i32 : i32, i32, i32
  }
}

</mosaic_0001>

<bundles_post_ra>
// kernel: tpu_custom_call.1
= control target key start
LH: loop header
LB: loop body
LE: loop exit
PB: predicated region body
PF: predicated region fallthrough
CT: control target
= control target key end

     0   :  { %9 = vsyncpa [#allocation4], 0  ;;  %s1513_s0 = inlined_call_operand.hbm [shape: bf16[2,16,64], index: 0, kind: input, shape index: {}]   ;;  %s1514_s1 = inlined_call_operand.hbm [shape: bf16[1,32,48], index: 1, kind: input, shape index: {}]   ;;  %s1515_s2 = inlined_call_operand.hbm [shape: bf16[3,64,256], index: 2, kind: input, shape index: {}]   ;;  %s1516_s3 = inlined_call_operand.vmem [shape: f32[1,256], index: 3, kind: input, shape index: {}]   ;;  %s1517_s4 = inlined_call_operand.hbm [shape: f32[2,32,256], index: 4, kind: output, shape index: {}]  }
   0x1   :  { %11 = vsyncpa [#allocation4 + $0x1], 0 }
   0x2   :  { %12 = vsyncpa [#allocation7], 0 }
   0x3   :  { %13 = vsyncpa [#allocation5], 0 }
   0x4   :  { %15 = vsyncpa [#allocation5 + $0x1], 0  ;;  %s1293_s15 = smov 0   ;;  %s1295_s16 = smov 0  }
   0x5   :  { %s1297_s17 = smov 0   ;;  %s1299_s18 = smov 0  }
   0x6   :  { %s1301_s19 = smov 0   ;;  %s1303_s20 = smov 0  }
   0x7 LB: > { %s885_s21 = sadd.s32 4294967295, %s1255_s20   ;;  %s886_s22 = sadd.s32 4294967294, %s1255_s20   ;;  %s1255_s20 = sphi %s1303_s20, %s21_s20   ;;  %s1251_s19 = sphi %s1301_s19, %s1536_s19   ;;  %s1247_s18 = sphi %s1299_s18, %s1535_s18   ;;  %s1243_s17 = sphi %s1297_s17, %s1534_s17   ;;  %s1239_s16 = sphi %s1295_s16, %s1533_s16   ;;  %s1235_s15 = sphi %s1293_s15, %s1532_s15  }
   0x8   : > { %p53_p0 = scmp.ne.s32.totalorder %s1239_s16, %s1235_s15  ;;  %p1327_p1 = scmp.eq.s32.totalorder %s885_s21, 0 }
   0x9   : > { %p1331_p2 = scmp.eq.s32.totalorder %s885_s21, 1  ;;  %p153_p3 = scmp.eq.s32.totalorder %s886_s22, 1 }
   0xa   : > { %p1337_p4 = por %p1327_p1, %p53_p0  ;;  %p887_p5 = scmp.ge.s32.totalorder %s1255_s20, 1 }
   0xb   : > { %p1342_p6 = por %p153_p3, %p53_p0  ;;  %p160_p7 = scmp.lt.s32.totalorder %s1255_s20, 3 }
   0xc   : > { %s1257_s28 = smov [#allocation6]   ;;  %s1258_s5 = smov [#allocation8]  }
   0xd   : > { %s1523_s26 = scalar_select %p1342_p6, 1, 0 }
   0xe   : > { %p1347_p8 = pnand %p887_p5, %p160_p7  ;;  %s175_s29 = sshll.u32 %s1257_s28, 4  ;;  %s176_s29 = int_to_ptr.vmem [resolvable:$true] %s175_s29 }
   0xf   : > { %s188_s6 = sshll.u32 %s1258_s5, 4  ;;  %s1102_s7 = scalar_lea.vmem %s176_s29, 256  ;;  %s189_s6 = int_to_ptr.vmem [resolvable:$true] %s188_s6 }
  0x10   : > { %p974_p9 = pneg %p1347_p8  ;;  %p1103_p13 = scmp.ne.s32.totalorder %s176_s29, %s1102_s7 }
  0x11   : > { %p1110_p5 = scmp.lt.s32.totalorder %s176_s29, %s176_s29  ;;  %p1111_p7 = scmp.lt.s32.totalorder %s1102_s7, %s1102_s7 }
  0x12   : > { %p1356_p11 = pnand %p974_p9, %p1327_p1 }
  0x13   : > { %p1112_p10 = por %p1111_p7, %p1110_p5 }
  0x14   : > { %p1093_p12 = pneg %p1356_p11 }
  0x16   : > { %p1105_p0 = pnand %p1103_p13, %p1093_p12 }
  0x18   : > { %p1106_p3 = pneg %p1105_p0 }
  0x1a   : > { %p1113_p9 = pnand %p1112_p10, %p1106_p3 }
  0x1c   : > { %1116 = shalt.err (!%p1113_p9)
}
  0x1d   : > { %s1518_s8 = smov 64   ;;  %s1519_s9 = smov 4  }
  0x1e   : > { %977 = dma.hbm_to_vmem [thread:$0]  (!%p1356_p11), %s1514_s1, 256, %s176_s29, [#allocation7], %s1518_s8, %s1518_s8, %s1519_s9  }
  0x1f   : > { %s1128_s12 = scalar_lea.vmem %s189_s6, 3072  ;;  %p1136_p10 = scmp.lt.s32.totalorder %s189_s6, %s189_s6 }
  0x20   : > { %p1129_p13 = scmp.ne.s32.totalorder %s189_s6, %s1128_s12  ;;  %p1137_p3 = scmp.lt.s32.totalorder %s1128_s12, %s1128_s12 }
  0x22   : > { %p1131_p0 = pnand %p1129_p13, %p1093_p12  ;;  %p1138_p7 = por %p1137_p3, %p1136_p10 }
  0x24   : > { %p1132_p5 = pneg %p1131_p0 }
  0x26   : > { %p1139_p9 = pnand %p1138_p7, %p1132_p5 }
  0x28   : > { %1142 = shalt.err (!%p1139_p9)
}
  0x29   : > { %s1261_s13 = smov 128   ;;  %s1262_s14 = smov 8  }
  0x2a   : > { %980 = dma.hbm_to_vmem [thread:$0]  (!%p1356_p11), %s1515_s2, 3072, %s189_s6, [#allocation7], %s1261_s13, %s1261_s13, %s1262_s14  }
  0x2b   : > { %s33_s28 = sadd.s32 1, %s1251_s19  ;;  %s40_s29 = sadd.s32 1, %s1243_s17 }
  0x2c   : > { %p35_p12 = scmp.ge.s32.totalorder %s33_s28, 2  ;;  %p47_p13 = scmp.ne.s32.totalorder %s1243_s17, %s1239_s16 }
  0x2d   : > { %p48_p0 = scmp.eq.s32.totalorder %s1255_s20, 0  ;;  %p991_p5 = scmp.lt.s32.totalorder %s1255_s20, 2 }
  0x2e   : > { %s1538_s28 = smov (%p35_p12, %s33_s28), 0  ;;  %p1391_p3 = por %p1331_p2, %p47_p13 }
  0x2f   : > { %p49_p10 = por %p48_p0, %p47_p13  ;;  %s37_s30 = ssub.s32 %s1251_s19, %s1538_s28 }
  0x30   : > { %s205_s7 = sand.u32 1, %s1243_s17   ;;  %p38_p7 = scmp.eq.s32.totalorder %s37_s30, 0 }
  0x31   : > { %s891_s6 = sshll.u32 %s205_s7, 3  ;;  %s948_s10 = sshll.u32 %s1251_s19, 7 }
  0x32   : > { %s1400_s11 = scalar_select %p38_p7, %s1243_s17, %s40_s29  }
  0x33   : > { %s215_s14 = scalar_lea.hbm %s1513_s0, %s948_s10  ;;  %s209_s21 = scalar_lea.vmem [#allocation3], %s891_s6 }
  0x34   : > { %s216_s22 = sshll.u32 %s209_s21, 4  ;;  %p1407_p11 = pnand %p991_p5, %p49_p10  ;;  %s217_s22 = int_to_ptr.vmem [resolvable:$true] %s216_s22 }
  0x35   : > { %s206_s8 = scalar_lea.sflag [#allocation4], %s205_s7  ;;  %s1156_s30 = scalar_lea.vmem %s217_s22, 128 }
  0x36   : > { %p1145_p2 = pneg %p1407_p11  ;;  %p1157_p9 = scmp.ne.s32.totalorder %s217_s22, %s1156_s30 }
  0x37   : > { %s1263_s29 = smov [#allocation3]  }
  0x38   : > { %p1159_p12 = pnand %p1157_p9, %p1145_p2  ;;  %s1161_s9 = sshll.u32 %s1263_s29, 4  ;;  %s1162_s9 = int_to_ptr.vmem [resolvable:$false] %s1161_s9 }
  0x39   : > { %s1163_s10 = scalar_lea.vmem %s1162_s9, 256  ;;  %p1164_p0 = scmp.lt.s32.totalorder %s217_s22, %s1162_s9 }
  0x3a   : > { %p1160_p13 = pneg %p1159_p12  ;;  %p1165_p7 = scmp.lt.s32.totalorder %s1163_s10, %s1156_s30 }
  0x3c   : > { %p1166_p6 = por %p1165_p7, %p1164_p0 }
  0x3e   : > { %p1167_p5 = pnand %p1166_p6, %p1160_p13 }
  0x40   : > { %1170 = shalt.err (!%p1167_p5)
}
  0x41   : > { %s1528_s6 = smov 4   ;;  %s1529_s12 = smov 64  }
  0x42   : > { %984 = dma.hbm_to_vmem [thread:$0]  (!%p1407_p11), %s215_s14, 128, %s217_s22, %s206_s8, %s1529_s12, %s1529_s12, %s1528_s6  }
  0x43   : > { %228 = sbr.rel (%p1347_p8) target bundleno = 550 (0x226), region = 36  ;;  %s1421_s7 = sand.u32 (!%p1347_p8), 1, %s1239_s16  }
  0x44   : > { %s895_s9 = sshll.u32 (!%p1347_p8), %s1421_s7, 3  ;;  %s231_s13 = scalar_lea.sflag (!%p1347_p8), [#allocation4], %s1421_s7 }
  0x45   : > { %s1425_s21 = scalar_lea.vmem (!%p1347_p8), [#allocation3], %s895_s9 }
  0x48   : > { %1222 = dma.done.wait (%p1337_p4), %s231_s13, 128  }
  0x49   : > { %1224 = vsyncadd (%p1337_p4), %s231_s13, 4294967168 }
  0x4a   : > { %1226 = dma.done.wait (%p1327_p1), [#allocation7], 3328  }
  0x4b   : > { %1228 = vsyncadd (%p1327_p1), [#allocation7], 4294963968  ;;  %v1264_v0 = vmov 0   ;;  %v1052_v1 = vld [vmem:[#allocation8 + $0x34] ss:$8 sps:$4 sm:$0xff]   ;;  %v1067_v16 = vld [vmem:[%s1425_s21] sm:$0xff]   ;;  %v613_v46 = vlaneseq }
  0x4c   : > { %364 = vmatprep.mubr.bf16.mxu0 %v1264_v0  ;;  %470 = vmatprep.mubr.bf16.mxu1 %v1264_v0  ;;  %v1054_v2 = vld [vmem:[#allocation8 + $0x30] ss:$8 sps:$4 sm:$0xff]   ;;  %v1055_v3 = vld [vmem:[#allocation8 + $0x24] ss:$8 sps:$4 sm:$0xff]   ;;  %v1057_v4 = vld [vmem:[#allocation8 + $0x20] ss:$8 sps:$4 sm:$0xff]  }
  0x4d   : > { %340 = vmatprep.subr.bf16.mxu0 %v1052_v1  ;;  %v1058_v5 = vld [vmem:[#allocation8 + $0x14] ss:$8 sps:$4 sm:$0xff]   ;;  %v1066_v7 = vld [vmem:[#allocation8 + $0x70] ss:$8 sps:$4 sm:$0xff]   ;;  %v1061_v9 = vld [vmem:[#allocation8 + $0x4] ss:$8 sps:$4 sm:$0xff]  }
  0x4e   : > { %341 = vmatpush1.bf16.msra.mxu0 %v1054_v2  ;;  %v1064_v6 = vld [vmem:[#allocation8 + $0x74] ss:$8 sps:$4 sm:$0xff]   ;;  %v1060_v8 = vld [vmem:[#allocation8 + $0x10] ss:$8 sps:$4 sm:$0xff]   ;;  %v1071_v10 = vld [vmem:[#allocation8 + $0x64] ss:$8 sps:$4 sm:$0xff]  }
  0x4f   : > { %342 = vmatprep.subr.bf16.mxu0 %v1055_v3  ;;  %446 = vmatprep.subr.bf16.mxu1 %v1064_v6  ;;  %v1073_v11 = vld [vmem:[#allocation8 + $0x60] ss:$8 sps:$4 sm:$0xff]   ;;  %v1070_v13 = vld [vmem:[#allocation8 + $0xb4] ss:$8 sps:$4 sm:$0xff]   ;;  %v1079_v15 = vld [vmem:[#allocation8 + $0x50] ss:$8 sps:$4 sm:$0xff]  }
  0x50   : > { %447 = vmatpush1.bf16.msra.mxu1 %v1066_v7  ;;  %v1063_v12 = vld [vmem:[#allocation8] ss:$8 sps:$4 sm:$0xff]   ;;  %v1077_v14 = vld [vmem:[#allocation8 + $0x54] ss:$8 sps:$4 sm:$0xff]   ;;  %vm328_vm0 = vcmask 523264   ;;  %vm663_vm1 = vcmask 392192  }
  0x51   : > { %448 = vmatprep.subr.bf16.mxu1 %v1071_v10  ;;  %v1068_v17 = vld [vmem:[#allocation8 + $0xb0] ss:$8 sps:$4 sm:$0xff]   ;;  %v1083_v18 = vld [vmem:[#allocation8 + $0x44] ss:$8 sps:$4 sm:$0xff]   ;;  %v1085_v20 = vld [vmem:[#allocation8 + $0x40] ss:$8 sps:$4 sm:$0xff]  }
  0x52   : > { %343 = vmatpush1.bf16.msra.mxu0 %v1057_v4  ;;  %v1076_v19 = vld [vmem:[#allocation8 + $0xa4] ss:$8 sps:$4 sm:$0xff]   ;;  %v1074_v21 = vld [vmem:[#allocation8 + $0xa0] ss:$8 sps:$4 sm:$0xff]   ;;  %v1082_v22 = vld [vmem:[#allocation8 + $0x94] ss:$8 sps:$4 sm:$0xff]  }
  0x53   : > { %344 = vmatprep.subr.bf16.mxu0 %v1058_v5  ;;  %v1080_v23 = vld [vmem:[#allocation8 + $0x90] ss:$8 sps:$4 sm:$0xff]   ;;  %v1088_v24 = vld [vmem:[#allocation8 + $0x84] ss:$8 sps:$4 sm:$0xff]   ;;  %v1086_v25 = vld [vmem:[#allocation8 + $0x80] ss:$8 sps:$4 sm:$0xff]  }
  0x54   : > { %449 = vmatpush1.bf16.msra.mxu1 %v1073_v11  ;;  %v1089_v44 = vld [vmem:[#allocation6] sm:$0xff]   ;;  %v1090_v45 = vld [vmem:[#allocation6 + $0x8] sm:$0xff]   ;;  %v614_v47 = vshrl.u32 %v613_v46, 7  ;;  %v611_v49 = vld [vmem:[%s1516_s3] sm:$0x3]  ;;  %s898_s27 = sshll.u32 %s1421_s7, 6 }
  0x55   : > { %450 = vmatprep.subr.bf16.mxu1 %v1077_v14  ;;  %s1448_s8 = scalar_lea.vmem [#allocation9], %s898_s27  ;;  %s955_s14 = sshll.u32 %s1247_s18, 10 }
  0x56   : > { %345 = vmatpush1.bf16.msra.mxu0 %v1060_v8  ;;  %v615_v48 = vsub.s32 0, %v614_v47  ;;  %v619_v50 = vsub.s32 1, %v614_v47  ;;  %s780_s22 = sshll.u32 %s1448_s8, 4  ;;  %s1461_s29 = scalar_lea.hbm %s1517_s4, %s955_s14  ;;  %s1463_s22 = int_to_ptr.vmem [resolvable:$true] %s780_s22 }
  0x57   : > { %346 = vmatprep.subr.bf16.mxu0 %v1061_v9  ;;  %s764_s18 = scalar_lea.sflag [#allocation5], %s1421_s7  ;;  %s1171_s10 = scalar_lea.vmem %s1463_s22, 1024 }
  0x58   : > { %451 = vmatpush1.bf16.msra.mxu1 %v1079_v15  ;;  %v616_v51 = vrot.slane %v611_v49, %v615_v48  ;;  %v620_v52 = vrot.slane %v611_v49, %v619_v50  ;;  %p1172_p1 = scmp.ne.s32.totalorder %s1463_s22, %s1171_s10  ;;  %s1265_s6 = smov [#allocation9]  }
  0x59   : > { %452 = vmatprep.subr.bf16.mxu1 %v1083_v18  ;;  %s1175_s12 = sshll.u32 %s1265_s6, 4  ;;  %s1176_s12 = int_to_ptr.vmem [resolvable:$false] %s1175_s12 }
  0x5a   : > { %347 = vmatpush1.bf16.msra.mxu0 %v1063_v12  ;;  %p1173_p4 = pnand %p1172_p1, %p1391_p3  ;;  %s1177_s9 = scalar_lea.vmem %s1176_s12, 2048 }
  0x5b   : > { %552 = vmatprep.subr.bf16.mxu0 %v1070_v13  ;;  %p1178_p8 = scmp.lt.s32.totalorder %s1463_s22, %s1176_s12  ;;  %p1179_p10 = scmp.lt.s32.totalorder %s1177_s9, %s1171_s10 }
  0x5c   : > { %453 = vmatpush1.bf16.msra.mxu1 %v1085_v20  ;;  %p1174_p6 = pneg %p1173_p4 }
  0x5d   : > { %908 = vmatmul.mubr.msk.bf16.vlgmr.msra.gmra.mxu0 %vm328_vm0, %v1067_v16  ;;  %p1180_p11 = por %p1179_p10, %p1178_p8 }
  0x5e   : > { %553 = vmatpush1.bf16.msra.mxu0 %v1068_v17  ;;  %576 = vmatprep.mubr.bf16.mxu0 %v1264_v0 }
  0x5f   : > { %554 = vmatprep.subr.bf16.mxu0 %v1076_v19  ;;  %919 = vmatmul.mubr.msk.bf16.vlgmr.msra.gmra.mxu1 %vm328_vm0, %v1067_v16  ;;  %p1181_p2 = pnand %p1180_p11, %p1174_p6 }
  0x60   : > { %702 = vmatprep.mubr.bf16.mxu1 %v1264_v0 }
  0x62   : > { %555 = vmatpush1.bf16.msra.mxu0 %v1074_v21 }
  0x63   : > { %556 = vmatprep.subr.bf16.mxu0 %v1082_v22 }
  0x66   : > { %557 = vmatpush1.bf16.msra.mxu0 %v1080_v23 }
  0x67   : > { %558 = vmatprep.subr.bf16.mxu0 %v1088_v24 }
  0x6a   : > { %559 = vmatpush1.bf16.msra.mxu0 %v1086_v25 }
  0x6d   : > { %930 = vmatmul.mubr.msk.bf16.vlgmr.msra.gmra.mxu0 %vm328_vm0, %v1067_v16 }
 0x11d   : > { %v366_v26 = vpop.f32.mrf.mxu0 }
 0x11f   : > { %v368_v27 = vpop.f32.mrf.mxu0  ;;  %v472_v29 = vpop.f32.mrf.mxu1 }
 0x121   : > { %v370_v28 = vpop.f32.mrf.mxu0  ;;  %v474_v31 = vpop.f32.mrf.mxu1 }
 0x122   : > { %v956_v43 = vpack.c.bf16 %v370_v28, %v366_v26 }
 0x123   : > { %v372_v30 = vpop.f32.mrf.mxu0  ;;  %v476_v33 = vpop.f32.mrf.mxu1 }
 0x124   : > { %v958_v41 = vpack.c.bf16 %v476_v33, %v472_v29  ;;  %v957_v42 = vpack.c.bf16 %v372_v30, %v368_v27 }
 0x125   : > { %v478_v36 = vpop.f32.mrf.mxu1 }
 0x126   : > { %v959_v40 = vpack.c.bf16 %v478_v36, %v474_v31 }
 0x12d   : > { %v578_v32 = vpop.f32.mrf.mxu0 }
 0x12f   : > { %v580_v34 = vpop.f32.mrf.mxu0 }
 0x131   : > { %v582_v35 = vpop.f32.mrf.mxu0 }
 0x132   : > { %v960_v39 = vpack.c.bf16 %v582_v35, %v578_v32 }
 0x133   : > { %v584_v37 = vpop.f32.mrf.mxu0 }
 0x134   : > { %v961_v38 = vpack.c.bf16 %v584_v37, %v580_v34 }
 0x136   : > { %680 = vmatprep.subr.bf16.mxu1 %v961_v38 }
 0x137   : > { %681 = vmatpush1.bf16.msra.mxu1 %v960_v39 }
 0x138   : > { %682 = vmatprep.subr.bf16.mxu1 %v959_v40 }
 0x13b   : > { %683 = vmatpush1.bf16.msra.mxu1 %v958_v41 }
 0x13c   : > { %684 = vmatprep.subr.bf16.mxu1 %v957_v42 }
 0x13f   : > { %685 = vmatpush1.bf16.msra.mxu1 %v956_v43 }
 0x142   : > { %941 = vmatmul.mubr.msk.bf16.vlgmr.msra.gmra.mxu1 %vm663_vm1, %v1089_v44 }
 0x143   : > { %712 = vmatprep.mubr.bf16.mxu1 %v1264_v0 }
 0x14a   : > { %942 = vmatmul.mubr.msk.bf16.gmra.mxu1 %vm663_vm1, %v1090_v45 }
 0x202   : > { %v704_v53 = vpop.f32.mrf.mxu1 }
 0x203   : > { %v705_v54 = vadd.f32 %v704_v53, %v616_v51 }
 0x204   : > { %v706_v55 = vpop.f32.mrf.mxu1 }
 0x205   : > { %vm723_vm2 = vcmp.ge.f32.partialorder %v705_v54, 0.0  ;;  %v731_v56 = vmul.f32 0.2, %v705_v54  ;;  %v707_v57 = vadd.f32 %v706_v55, %v620_v52 }
 0x206   : > { %v708_v58 = vpop.f32.mrf.mxu1 }
 0x207   : > { %v739_v59 = vsel %vm723_vm2, %v705_v54, %v731_v56  ;;  %vm724_vm3 = vcmp.ge.f32.partialorder %v707_v57, 0.0  ;;  %v732_v60 = vmul.f32 0.2, %v707_v57  ;;  %v709_v61 = vadd.f32 %v708_v58, %v616_v51 }
 0x208   : > { %v747_v62 = vmul.f32 1.4142135, %v739_v59  ;;  %v710_v63 = vpop.f32.mrf.mxu1 }
 0x209   : > { %v740_v0 = vsel %vm724_vm3, %v707_v57, %v732_v60  ;;  %vm725_vm4 = vcmp.ge.f32.partialorder %v709_v61, 0.0  ;;  %v733_v1 = vmul.f32 0.2, %v709_v61  ;;  %v711_v2 = vadd.f32 %v710_v63, %v620_v52 }
 0x20a   : > { %755 = vst [vmem:[%s1448_s8] sm:$0xff] %v747_v62  ;;  %v748_v3 = vmul.f32 1.4142135, %v740_v0  ;;  %v714_v4 = vpop.f32.mrf.mxu1 }
 0x20b   : > { %v741_v5 = vsel %vm725_vm4, %v709_v61, %v733_v1  ;;  %vm726_vm5 = vcmp.ge.f32.partialorder %v711_v2, 0.0  ;;  %v734_v6 = vmul.f32 0.2, %v711_v2  ;;  %v715_v7 = vadd.f32 %v714_v4, %v616_v51 }
 0x20c   : > { %756 = vst [vmem:[%s1448_s8 + $0x8] sm:$0xff] %v748_v3  ;;  %v749_v8 = vmul.f32 1.4142135, %v741_v5  ;;  %v716_v9 = vpop.f32.mrf.mxu1 }
 0x20d   : > { %v742_v10 = vsel %vm726_vm5, %v711_v2, %v734_v6  ;;  %vm727_vm6 = vcmp.ge.f32.partialorder %v715_v7, 0.0  ;;  %v735_v11 = vmul.f32 0.2, %v715_v7  ;;  %v717_v12 = vadd.f32 %v716_v9, %v620_v52 }
 0x20e   : > { %757 = vst [vmem:[%s1448_s8 + $0x10] sm:$0xff] %v749_v8  ;;  %v750_v13 = vmul.f32 1.4142135, %v742_v10  ;;  %v718_v14 = vpop.f32.mrf.mxu1 }
 0x20f   : > { %v743_v15 = vsel %vm727_vm6, %v715_v7, %v735_v11  ;;  %vm728_vm7 = vcmp.ge.f32.partialorder %v717_v12, 0.0  ;;  %v736_v16 = vmul.f32 0.2, %v717_v12  ;;  %v719_v17 = vadd.f32 %v718_v14, %v616_v51 }
 0x210   : > { %758 = vst [vmem:[%s1448_s8 + $0x18] sm:$0xff] %v750_v13  ;;  %v751_v18 = vmul.f32 1.4142135, %v743_v15  ;;  %v720_v19 = vpop.f32.mrf.mxu1 }
 0x211   : > { %v744_v20 = vsel %vm728_vm7, %v717_v12, %v736_v16  ;;  %vm729_vm8 = vcmp.ge.f32.partialorder %v719_v17, 0.0  ;;  %v737_v21 = vmul.f32 0.2, %v719_v17  ;;  %v721_v22 = vadd.f32 %v720_v19, %v620_v52 }
 0x212   : > { %759 = vst [vmem:[%s1448_s8 + $0x20] sm:$0xff] %v751_v18  ;;  %v752_v23 = vmul.f32 1.4142135, %v744_v20 }
 0x213   : > { %v745_v24 = vsel %vm729_vm8, %v719_v17, %v737_v21  ;;  %vm730_vm9 = vcmp.ge.f32.partialorder %v721_v22, 0.0  ;;  %v738_v25 = vmul.f32 0.2, %v721_v22 }
 0x214   : > { %760 = vst [vmem:[%s1448_s8 + $0x28] sm:$0xff] %v752_v23  ;;  %v753_v26 = vmul.f32 1.4142135, %v745_v24 }
 0x215   : > { %v746_v27 = vsel %vm730_vm9, %v721_v22, %v738_v25 }
 0x216   : > { %761 = vst [vmem:[%s1448_s8 + $0x30] sm:$0xff] %v753_v26  ;;  %v754_v28 = vmul.f32 1.4142135, %v746_v27 }
 0x218   : > { %762 = vst [vmem:[%s1448_s8 + $0x38] sm:$0xff] %v754_v28 }
 0x219   : > { %1184 = shalt.err (!%p1181_p2)
}
 0x21a   : > { %s1185_s13 = scalar_lea.hbm %s1461_s29, 1024  ;;  %s1189_s25 = scalar_lea.hbm %s1517_s4, 2048 }
 0x21b   : > { %p1186_p9 = scmp.ne.s32.totalorder %s1461_s29, %s1185_s13  ;;  %p1190_p0 = scmp.lt.s32.totalorder %s1461_s29, %s1517_s4 }
 0x21c   : > { %p1191_p7 = scmp.lt.s32.totalorder %s1189_s25, %s1185_s13 }
 0x21d   : > { %p1187_p12 = pnand %p1186_p9, %p1391_p3 }
 0x21e   : > { %p1192_p5 = por %p1191_p7, %p1190_p0 }
 0x21f   : > { %p1188_p13 = pneg %p1187_p12 }
 0x221   : > { %p1193_p1 = pnand %p1192_p5, %p1188_p13 }
 0x223   : > { %1196 = shalt.err (!%p1193_p1)
}
 0x224   : > { %s1266_s14 = smov 256   ;;  %s1267_s24 = smov 16  }
 0x225   : > { %972 = dma.vmem_to_hbm [thread:$0]  (%p1391_p3), %s1463_s22, 1024, %s1461_s29, %s764_s18, %s1266_s14, %s1266_s14, %s1267_s24  }
 0x226 PF: > { %s795_s30 = sand.u32 1, %s1235_s15   ;;  %p1530_p4 = scmp.ne.s32.totalorder %s1523_s26, 0 }
 0x227   : > { %p1531_p6 = scmp.ge.s32.totalorder %s1255_s20, 2  ;;  %s796_s10 = scalar_lea.sflag [#allocation5], %s795_s30 }
 0x229   : > { %p986_p8 = pnand %p1531_p6, %p1530_p4 }
 0x22b   : > { %p987_p10 = pneg %p986_p8 }
 0x22d   : > { %1230 = dma.done.wait (%p987_p10), %s796_s10, 1024  }
 0x22e   : > { %1232 = vsyncadd (%p987_p10), %s796_s10, 4294966272  ;;  %s21_s20 = sadd.s32 1, %s1255_s20   ;;  %s1532_s15 = smov %s1239_s16 }
 0x22f   : > { %p18_p11 = scmp.ge.s32.totalorder %s21_s20, 4   ;;  %s1533_s16 = smov %s1243_s17 }
 0x230   : > { %s1534_s17 = smov %s1400_s11  ;;  %s1535_s18 = smov %s1251_s19 }
 0x231   : > { %s1536_s19 = smov %s1538_s28  ;;  %20 = sbr.rel (!%p18_p11) target bundleno = 7 (0x7), region = 96 }
 0x236   :  { %801 = vsyncpa [#allocation4], 1 }
 0x237   :  { %803 = vsyncpa [#allocation4 + $0x1], 1 }
 0x238   :  { %804 = vsyncpa [#allocation7], 1 }
 0x239   :  { %805 = vsyncpa [#allocation5], 1 }
 0x23a   :  { %807 = vsyncpa [#allocation5 + $0x1], 1 }

// kernel: tpu_custom_call.1
= control target key start
LH: loop header
LB: loop body
LE: loop exit
PB: predicated region body
PF: predicated region fallthrough
CT: control target
= control target key end

     0   :  { %9 = vsyncpa [#allocation4], 0  ;;  %s1513_s0 = inlined_call_operand.hbm [shape: bf16[2,16,64], index: 0, kind: input, shape index: {}]   ;;  %s1514_s1 = inlined_call_operand.hbm [shape: bf16[1,32,48], index: 1, kind: input, shape index: {}]   ;;  %s1515_s2 = inlined_call_operand.hbm [shape: bf16[3,64,256], index: 2, kind: input, shape index: {}]   ;;  %s1516_s3 = inlined_call_operand.vmem [shape: f32[1,256], index: 3, kind: input, shape index: {}]   ;;  %s1517_s4 = inlined_call_operand.hbm [shape: f32[2,32,256], index: 4, kind: output, shape index: {}]  }
   0x1   :  { %11 = vsyncpa [#allocation4 + $0x1], 0 }
   0x2   :  { %12 = vsyncpa [#allocation7], 0 }
   0x3   :  { %13 = vsyncpa [#allocation5], 0 }
   0x4   :  { %15 = vsyncpa [#allocation5 + $0x1], 0  ;;  %s1293_s15 = smov 0   ;;  %s1295_s16 = smov 0  }
   0x5   :  { %s1297_s17 = smov 0   ;;  %s1299_s18 = smov 0  }
   0x6   :  { %s1301_s19 = smov 0   ;;  %s1303_s20 = smov 0  }
   0x7 LB: > { %s885_s21 = sadd.s32 4294967295, %s1255_s20   ;;  %s886_s22 = sadd.s32 4294967294, %s1255_s20   ;;  %s1255_s20 = sphi %s1303_s20, %s21_s20   ;;  %s1251_s19 = sphi %s1301_s19, %s1536_s19   ;;  %s1247_s18 = sphi %s1299_s18, %s1535_s18   ;;  %s1243_s17 = sphi %s1297_s17, %s1534_s17   ;;  %s1239_s16 = sphi %s1295_s16, %s1533_s16   ;;  %s1235_s15 = sphi %s1293_s15, %s1532_s15  }
   0x8   : > { %p53_p0 = scmp.ne.s32.totalorder %s1239_s16, %s1235_s15  ;;  %p1327_p1 = scmp.eq.s32.totalorder %s885_s21, 0 }
   0x9   : > { %p1331_p2 = scmp.eq.s32.totalorder %s885_s21, 1  ;;  %p153_p3 = scmp.eq.s32.totalorder %s886_s22, 1 }
   0xa   : > { %p1337_p4 = por %p1327_p1, %p53_p0  ;;  %p887_p5 = scmp.ge.s32.totalorder %s1255_s20, 1 }
   0xb   : > { %p1342_p6 = por %p153_p3, %p53_p0  ;;  %p160_p7 = scmp.lt.s32.totalorder %s1255_s20, 3 }
   0xc   : > { %s1257_s28 = smov [#allocation6]   ;;  %s1258_s5 = smov [#allocation8]  }
   0xd   : > { %s1523_s26 = scalar_select %p1342_p6, 1, 0 }
   0xe   : > { %p1347_p8 = pnand %p887_p5, %p160_p7  ;;  %s175_s29 = sshll.u32 %s1257_s28, 4  ;;  %s176_s29 = int_to_ptr.vmem [resolvable:$true] %s175_s29 }
   0xf   : > { %s188_s6 = sshll.u32 %s1258_s5, 4  ;;  %s1102_s7 = scalar_lea.vmem %s176_s29, 256  ;;  %s189_s6 = int_to_ptr.vmem [resolvable:$true] %s188_s6 }
  0x10   : > { %p974_p9 = pneg %p1347_p8  ;;  %p1103_p13 = scmp.ne.s32.totalorder %s176_s29, %s1102_s7 }
  0x11   : > { %p1110_p5 = scmp.lt.s32.totalorder %s176_s29, %s176_s29  ;;  %p1111_p7 = scmp.lt.s32.totalorder %s1102_s7, %s1102_s7 }
  0x12   : > { %p1356_p11 = pnand %p974_p9, %p1327_p1 }
  0x13   : > { %p1112_p10 = por %p1111_p7, %p1110_p5 }
  0x14   : > { %p1093_p12 = pneg %p1356_p11 }
  0x16   : > { %p1105_p0 = pnand %p1103_p13, %p1093_p12 }
  0x18   : > { %p1106_p3 = pneg %p1105_p0 }
  0x1a   : > { %p1113_p9 = pnand %p1112_p10, %p1106_p3 }
  0x1c   : > { %1116 = shalt.err (!%p1113_p9)
}
  0x1d   : > { %s1518_s8 = smov 64   ;;  %s1519_s9 = smov 4  }
  0x1e   : > { %977 = dma.hbm_to_vmem [thread:$0]  (!%p1356_p11), %s1514_s1, 256, %s176_s29, [#allocation7], %s1518_s8, %s1518_s8, %s1519_s9  }
  0x1f   : > { %s1128_s12 = scalar_lea.vmem %s189_s6, 3072  ;;  %p1136_p10 = scmp.lt.s32.totalorder %s189_s6, %s189_s6 }
  0x20   : > { %p1129_p13 = scmp.ne.s32.totalorder %s189_s6, %s1128_s12  ;;  %p1137_p3 = scmp.lt.s32.totalorder %s1128_s12, %s1128_s12 }
  0x22   : > { %p1131_p0 = pnand %p1129_p13, %p1093_p12  ;;  %p1138_p7 = por %p1137_p3, %p1136_p10 }
  0x24   : > { %p1132_p5 = pneg %p1131_p0 }
  0x26   : > { %p1139_p9 = pnand %p1138_p7, %p1132_p5 }
  0x28   : > { %1142 = shalt.err (!%p1139_p9)
}
  0x29   : > { %s1261_s13 = smov 128   ;;  %s1262_s14 = smov 8  }
  0x2a   : > { %980 = dma.hbm_to_vmem [thread:$0]  (!%p1356_p11), %s1515_s2, 3072, %s189_s6, [#allocation7], %s1261_s13, %s1261_s13, %s1262_s14  }
  0x2b   : > { %s33_s28 = sadd.s32 1, %s1251_s19  ;;  %s40_s29 = sadd.s32 1, %s1243_s17 }
  0x2c   : > { %p35_p12 = scmp.ge.s32.totalorder %s33_s28, 2  ;;  %p47_p13 = scmp.ne.s32.totalorder %s1243_s17, %s1239_s16 }
  0x2d   : > { %p48_p0 = scmp.eq.s32.totalorder %s1255_s20, 0  ;;  %p991_p5 = scmp.lt.s32.totalorder %s1255_s20, 2 }
  0x2e   : > { %s1538_s28 = smov (%p35_p12, %s33_s28), 0  ;;  %p1391_p3 = por %p1331_p2, %p47_p13 }
  0x2f   : > { %p49_p10 = por %p48_p0, %p47_p13  ;;  %s37_s30 = ssub.s32 %s1251_s19, %s1538_s28 }
  0x30   : > { %s205_s7 = sand.u32 1, %s1243_s17   ;;  %p38_p7 = scmp.eq.s32.totalorder %s37_s30, 0 }
  0x31   : > { %s891_s6 = sshll.u32 %s205_s7, 3  ;;  %s948_s10 = sshll.u32 %s1251_s19, 7 }
  0x32   : > { %s1400_s11 = scalar_select %p38_p7, %s1243_s17, %s40_s29  }
  0x33   : > { %s215_s14 = scalar_lea.hbm %s1513_s0, %s948_s10  ;;  %s209_s21 = scalar_lea.vmem [#allocation3], %s891_s6 }
  0x34   : > { %s216_s22 = sshll.u32 %s209_s21, 4  ;;  %p1407_p11 = pnand %p991_p5, %p49_p10  ;;  %s217_s22 = int_to_ptr.vmem [resolvable:$true] %s216_s22 }
  0x35   : > { %s206_s8 = scalar_lea.sflag [#allocation4], %s205_s7  ;;  %s1156_s30 = scalar_lea.vmem %s217_s22, 128 }
  0x36   : > { %p1145_p2 = pneg %p1407_p11  ;;  %p1157_p9 = scmp.ne.s32.totalorder %s217_s22, %s1156_s30 }
  0x37   : > { %s1263_s29 = smov [#allocation3]  }
  0x38   : > { %p1159_p12 = pnand %p1157_p9, %p1145_p2  ;;  %s1161_s9 = sshll.u32 %s1263_s29, 4  ;;  %s1162_s9 = int_to_ptr.vmem [resolvable:$false] %s1161_s9 }
  0x39   : > { %s1163_s10 = scalar_lea.vmem %s1162_s9, 256  ;;  %p1164_p0 = scmp.lt.s32.totalorder %s217_s22, %s1162_s9 }
  0x3a   : > { %p1160_p13 = pneg %p1159_p12  ;;  %p1165_p7 = scmp.lt.s32.totalorder %s1163_s10, %s1156_s30 }
  0x3c   : > { %p1166_p6 = por %p1165_p7, %p1164_p0 }
  0x3e   : > { %p1167_p5 = pnand %p1166_p6, %p1160_p13 }
  0x40   : > { %1170 = shalt.err (!%p1167_p5)
}
  0x41   : > { %s1528_s6 = smov 4   ;;  %s1529_s12 = smov 64  }
  0x42   : > { %984 = dma.hbm_to_vmem [thread:$0]  (!%p1407_p11), %s215_s14, 128, %s217_s22, %s206_s8, %s1529_s12, %s1529_s12, %s1528_s6  }
  0x43   : > { %228 = sbr.rel (%p1347_p8) target bundleno = 550 (0x226), region = 36  ;;  %s1421_s7 = sand.u32 (!%p1347_p8), 1, %s1239_s16  }
  0x44   : > { %s895_s9 = sshll.u32 (!%p1347_p8), %s1421_s7, 3  ;;  %s231_s13 = scalar_lea.sflag (!%p1347_p8), [#allocation4], %s1421_s7 }
  0x45   : > { %s1425_s21 = scalar_lea.vmem (!%p1347_p8), [#allocation3], %s895_s9 }
  0x48   : > { %1222 = dma.done.wait (%p1337_p4), %s231_s13, 128  }
  0x49   : > { %1224 = vsyncadd (%p1337_p4), %s231_s13, 4294967168 }
  0x4a   : > { %1226 = dma.done.wait (%p1327_p1), [#allocation7], 3328  }
  0x4b   : > { %1228 = vsyncadd (%p1327_p1), [#allocation7], 4294963968  ;;  %v1264_v0 = vmov 0   ;;  %v1052_v1 = vld [vmem:[#allocation8 + $0x34] ss:$8 sps:$4 sm:$0xff]   ;;  %v1067_v16 = vld [vmem:[%s1425_s21] sm:$0xff]   ;;  %v613_v46 = vlaneseq }
  0x4c   : > { %364 = vmatprep.mubr.bf16.mxu0 %v1264_v0  ;;  %470 = vmatprep.mubr.bf16.mxu1 %v1264_v0  ;;  %v1054_v2 = vld [vmem:[#allocation8 + $0x30] ss:$8 sps:$4 sm:$0xff]   ;;  %v1055_v3 = vld [vmem:[#allocation8 + $0x24] ss:$8 sps:$4 sm:$0xff]   ;;  %v1057_v4 = vld [vmem:[#allocation8 + $0x20] ss:$8 sps:$4 sm:$0xff]  }
  0x4d   : > { %340 = vmatprep.subr.bf16.mxu0 %v1052_v1  ;;  %v1058_v5 = vld [vmem:[#allocation8 + $0x14] ss:$8 sps:$4 sm:$0xff]   ;;  %v1066_v7 = vld [vmem:[#allocation8 + $0x70] ss:$8 sps:$4 sm:$0xff]   ;;  %v1061_v9 = vld [vmem:[#allocation8 + $0x4] ss:$8 sps:$4 sm:$0xff]  }
  0x4e   : > { %341 = vmatpush1.bf16.msra.mxu0 %v1054_v2  ;;  %v1064_v6 = vld [vmem:[#allocation8 + $0x74] ss:$8 sps:$4 sm:$0xff]   ;;  %v1060_v8 = vld [vmem:[#allocation8 + $0x10] ss:$8 sps:$4 sm:$0xff]   ;;  %v1071_v10 = vld [vmem:[#allocation8 + $0x64] ss:$8 sps:$4 sm:$0xff]  }
  0x4f   : > { %342 = vmatprep.subr.bf16.mxu0 %v1055_v3  ;;  %446 = vmatprep.subr.bf16.mxu1 %v1064_v6  ;;  %v1073_v11 = vld [vmem:[#allocation8 + $0x60] ss:$8 sps:$4 sm:$0xff]   ;;  %v1070_v13 = vld [vmem:[#allocation8 + $0xb4] ss:$8 sps:$4 sm:$0xff]   ;;  %v1079_v15 = vld [vmem:[#allocation8 + $0x50] ss:$8 sps:$4 sm:$0xff]  }
  0x50   : > { %447 = vmatpush1.bf16.msra.mxu1 %v1066_v7  ;;  %v1063_v12 = vld [vmem:[#allocation8] ss:$8 sps:$4 sm:$0xff]   ;;  %v1077_v14 = vld [vmem:[#allocation8 + $0x54] ss:$8 sps:$4 sm:$0xff]   ;;  %vm328_vm0 = vcmask 523264   ;;  %vm663_vm1 = vcmask 392192  }
  0x51   : > { %448 = vmatprep.subr.bf16.mxu1 %v1071_v10  ;;  %v1068_v17 = vld [vmem:[#allocation8 + $0xb0] ss:$8 sps:$4 sm:$0xff]   ;;  %v1083_v18 = vld [vmem:[#allocation8 + $0x44] ss:$8 sps:$4 sm:$0xff]   ;;  %v1085_v20 = vld [vmem:[#allocation8 + $0x40] ss:$8 sps:$4 sm:$0xff]  }
  0x52   : > { %343 = vmatpush1.bf16.msra.mxu0 %v1057_v4  ;;  %v1076_v19 = vld [vmem:[#allocation8 + $0xa4] ss:$8 sps:$4 sm:$0xff]   ;;  %v1074_v21 = vld [vmem:[#allocation8 + $0xa0] ss:$8 sps:$4 sm:$0xff]   ;;  %v1082_v22 = vld [vmem:[#allocation8 + $0x94] ss:$8 sps:$4 sm:$0xff]  }
  0x53   : > { %344 = vmatprep.subr.bf16.mxu0 %v1058_v5  ;;  %v1080_v23 = vld [vmem:[#allocation8 + $0x90] ss:$8 sps:$4 sm:$0xff]   ;;  %v1088_v24 = vld [vmem:[#allocation8 + $0x84] ss:$8 sps:$4 sm:$0xff]   ;;  %v1086_v25 = vld [vmem:[#allocation8 + $0x80] ss:$8 sps:$4 sm:$0xff]  }
  0x54   : > { %449 = vmatpush1.bf16.msra.mxu1 %v1073_v11  ;;  %v1089_v44 = vld [vmem:[#allocation6] sm:$0xff]   ;;  %v1090_v45 = vld [vmem:[#allocation6 + $0x8] sm:$0xff]   ;;  %v614_v47 = vshrl.u32 %v613_v46, 7  ;;  %v611_v49 = vld [vmem:[%s1516_s3] sm:$0x3]  ;;  %s898_s27 = sshll.u32 %s1421_s7, 6 }
  0x55   : > { %450 = vmatprep.subr.bf16.mxu1 %v1077_v14  ;;  %s1448_s8 = scalar_lea.vmem [#allocation9], %s898_s27  ;;  %s955_s14 = sshll.u32 %s1247_s18, 10 }
  0x56   : > { %345 = vmatpush1.bf16.msra.mxu0 %v1060_v8  ;;  %v615_v48 = vsub.s32 0, %v614_v47  ;;  %v619_v50 = vsub.s32 1, %v614_v47  ;;  %s780_s22 = sshll.u32 %s1448_s8, 4  ;;  %s1461_s29 = scalar_lea.hbm %s1517_s4, %s955_s14  ;;  %s1463_s22 = int_to_ptr.vmem [resolvable:$true] %s780_s22 }
  0x57   : > { %346 = vmatprep.subr.bf16.mxu0 %v1061_v9  ;;  %s764_s18 = scalar_lea.sflag [#allocation5], %s1421_s7  ;;  %s1171_s10 = scalar_lea.vmem %s1463_s22, 1024 }
  0x58   : > { %451 = vmatpush1.bf16.msra.mxu1 %v1079_v15  ;;  %v616_v51 = vrot.slane %v611_v49, %v615_v48  ;;  %v620_v52 = vrot.slane %v611_v49, %v619_v50  ;;  %p1172_p1 = scmp.ne.s32.totalorder %s1463_s22, %s1171_s10  ;;  %s1265_s6 = smov [#allocation9]  }
  0x59   : > { %452 = vmatprep.subr.bf16.mxu1 %v1083_v18  ;;  %s1175_s12 = sshll.u32 %s1265_s6, 4  ;;  %s1176_s12 = int_to_ptr.vmem [resolvable:$false] %s1175_s12 }
  0x5a   : > { %347 = vmatpush1.bf16.msra.mxu0 %v1063_v12  ;;  %p1173_p4 = pnand %p1172_p1, %p1391_p3  ;;  %s1177_s9 = scalar_lea.vmem %s1176_s12, 2048 }
  0x5b   : > { %552 = vmatprep.subr.bf16.mxu0 %v1070_v13  ;;  %p1178_p8 = scmp.lt.s32.totalorder %s1463_s22, %s1176_s12  ;;  %p1179_p10 = scmp.lt.s32.totalorder %s1177_s9, %s1171_s10 }
  0x5c   : > { %453 = vmatpush1.bf16.msra.mxu1 %v1085_v20  ;;  %p1174_p6 = pneg %p1173_p4 }
  0x5d   : > { %908 = vmatmul.mubr.msk.bf16.vlgmr.msra.gmra.mxu0 %vm328_vm0, %v1067_v16  ;;  %p1180_p11 = por %p1179_p10, %p1178_p8 }
  0x5e   : > { %553 = vmatpush1.bf16.msra.mxu0 %v1068_v17  ;;  %576 = vmatprep.mubr.bf16.mxu0 %v1264_v0 }
  0x5f   : > { %554 = vmatprep.subr.bf16.mxu0 %v1076_v19  ;;  %919 = vmatmul.mubr.msk.bf16.vlgmr.msra.gmra.mxu1 %vm328_vm0, %v1067_v16  ;;  %p1181_p2 = pnand %p1180_p11, %p1174_p6 }
  0x60   : > { %702 = vmatprep.mubr.bf16.mxu1 %v1264_v0 }
  0x62   : > { %555 = vmatpush1.bf16.msra.mxu0 %v1074_v21 }
  0x63   : > { %556 = vmatprep.subr.bf16.mxu0 %v1082_v22 }
  0x66   : > { %557 = vmatpush1.bf16.msra.mxu0 %v1080_v23 }
  0x67   : > { %558 = vmatprep.subr.bf16.mxu0 %v1088_v24 }
  0x6a   : > { %559 = vmatpush1.bf16.msra.mxu0 %v1086_v25 }
  0x6d   : > { %930 = vmatmul.mubr.msk.bf16.vlgmr.msra.gmra.mxu0 %vm328_vm0, %v1067_v16 }
 0x11d   : > { %v366_v26 = vpop.f32.mrf.mxu0 }
 0x11f   : > { %v368_v27 = vpop.f32.mrf.mxu0  ;;  %v472_v29 = vpop.f32.mrf.mxu1 }
 0x121   : > { %v370_v28 = vpop.f32.mrf.mxu0  ;;  %v474_v31 = vpop.f32.mrf.mxu1 }
 0x122   : > { %v956_v43 = vpack.c.bf16 %v370_v28, %v366_v26 }
 0x123   : > { %v372_v30 = vpop.f32.mrf.mxu0  ;;  %v476_v33 = vpop.f32.mrf.mxu1 }
 0x124   : > { %v958_v41 = vpack.c.bf16 %v476_v33, %v472_v29  ;;  %v957_v42 = vpack.c.bf16 %v372_v30, %v368_v27 }
 0x125   : > { %v478_v36 = vpop.f32.mrf.mxu1 }
 0x126   : > { %v959_v40 = vpack.c.bf16 %v478_v36, %v474_v31 }
 0x12d   : > { %v578_v32 = vpop.f32.mrf.mxu0 }
 0x12f   : > { %v580_v34 = vpop.f32.mrf.mxu0 }
 0x131   : > { %v582_v35 = vpop.f32.mrf.mxu0 }
 0x132   : > { %v960_v39 = vpack.c.bf16 %v582_v35, %v578_v32 }
 0x133   : > { %v584_v37 = vpop.f32.mrf.mxu0 }
 0x134   : > { %v961_v38 = vpack.c.bf16 %v584_v37, %v580_v34 }
 0x136   : > { %680 = vmatprep.subr.bf16.mxu1 %v961_v38 }
 0x137   : > { %681 = vmatpush1.bf16.msra.mxu1 %v960_v39 }
 0x138   : > { %682 = vmatprep.subr.bf16.mxu1 %v959_v40 }
 0x13b   : > { %683 = vmatpush1.bf16.msra.mxu1 %v958_v41 }
 0x13c   : > { %684 = vmatprep.subr.bf16.mxu1 %v957_v42 }
 0x13f   : > { %685 = vmatpush1.bf16.msra.mxu1 %v956_v43 }
 0x142   : > { %941 = vmatmul.mubr.msk.bf16.vlgmr.msra.gmra.mxu1 %vm663_vm1, %v1089_v44 }
 0x143   : > { %712 = vmatprep.mubr.bf16.mxu1 %v1264_v0 }
 0x14a   : > { %942 = vmatmul.mubr.msk.bf16.gmra.mxu1 %vm663_vm1, %v1090_v45 }
 0x202   : > { %v704_v53 = vpop.f32.mrf.mxu1 }
 0x203   : > { %v705_v54 = vadd.f32 %v704_v53, %v616_v51 }
 0x204   : > { %v706_v55 = vpop.f32.mrf.mxu1 }
 0x205   : > { %vm723_vm2 = vcmp.ge.f32.partialorder %v705_v54, 0.0  ;;  %v731_v56 = vmul.f32 0.2, %v705_v54  ;;  %v707_v57 = vadd.f32 %v706_v55, %v620_v52 }
 0x206   : > { %v708_v58 = vpop.f32.mrf.mxu1 }
 0x207   : > { %v739_v59 = vsel %vm723_vm2, %v705_v54, %v731_v56  ;;  %vm724_vm3 = vcmp.ge.f32.partialorder %v707_v57, 0.0  ;;  %v732_v60 = vmul.f32 0.2, %v707_v57  ;;  %v709_v61 = vadd.f32 %v708_v58, %v616_v51 }
 0x208   : > { %v747_v62 = vmul.f32 1.4142135, %v739_v59  ;;  %v710_v63 = vpop.f32.mrf.mxu1 }
 0x209   : > { %v740_v0 = vsel %vm724_vm3, %v707_v57, %v732_v60  ;;  %vm725_vm4 = vcmp.ge.f32.partialorder %v709_v61, 0.0  ;;  %v733_v1 = vmul.f32 0.2, %v709_v61  ;;  %v711_v2 = vadd.f32 %v710_v63, %v620_v52 }
 0x20a   : > { %755 = vst [vmem:[%s1448_s8] sm:$0xff] %v747_v62  ;;  %v748_v3 = vmul.f32 1.4142135, %v740_v0  ;;  %v714_v4 = vpop.f32.mrf.mxu1 }
 0x20b   : > { %v741_v5 = vsel %vm725_vm4, %v709_v61, %v733_v1  ;;  %vm726_vm5 = vcmp.ge.f32.partialorder %v711_v2, 0.0  ;;  %v734_v6 = vmul.f32 0.2, %v711_v2  ;;  %v715_v7 = vadd.f32 %v714_v4, %v616_v51 }
 0x20c   : > { %756 = vst [vmem:[%s1448_s8 + $0x8] sm:$0xff] %v748_v3  ;;  %v749_v8 = vmul.f32 1.4142135, %v741_v5  ;;  %v716_v9 = vpop.f32.mrf.mxu1 }
 0x20d   : > { %v742_v10 = vsel %vm726_vm5, %v711_v2, %v734_v6  ;;  %vm727_vm6 = vcmp.ge.f32.partialorder %v715_v7, 0.0  ;;  %v735_v11 = vmul.f32 0.2, %v715_v7  ;;  %v717_v12 = vadd.f32 %v716_v9, %v620_v52 }
 0x20e   : > { %757 = vst [vmem:[%s1448_s8 + $0x10] sm:$0xff] %v749_v8  ;;  %v750_v13 = vmul.f32 1.4142135, %v742_v10  ;;  %v718_v14 = vpop.f32.mrf.mxu1 }
 0x20f   : > { %v743_v15 = vsel %vm727_vm6, %v715_v7, %v735_v11  ;;  %vm728_vm7 = vcmp.ge.f32.partialorder %v717_v12, 0.0  ;;  %v736_v16 = vmul.f32 0.2, %v717_v12  ;;  %v719_v17 = vadd.f32 %v718_v14, %v616_v51 }
 0x210   : > { %758 = vst [vmem:[%s1448_s8 + $0x18] sm:$0xff] %v750_v13  ;;  %v751_v18 = vmul.f32 1.4142135, %v743_v15  ;;  %v720_v19 = vpop.f32.mrf.mxu1 }
 0x211   : > { %v744_v20 = vsel %vm728_vm7, %v717_v12, %v736_v16  ;;  %vm729_vm8 = vcmp.ge.f32.partialorder %v719_v17, 0.0  ;;  %v737_v21 = vmul.f32 0.2, %v719_v17  ;;  %v721_v22 = vadd.f32 %v720_v19, %v620_v52 }
 0x212   : > { %759 = vst [vmem:[%s1448_s8 + $0x20] sm:$0xff] %v751_v18  ;;  %v752_v23 = vmul.f32 1.4142135, %v744_v20 }
 0x213   : > { %v745_v24 = vsel %vm729_vm8, %v719_v17, %v737_v21  ;;  %vm730_vm9 = vcmp.ge.f32.partialorder %v721_v22, 0.0  ;;  %v738_v25 = vmul.f32 0.2, %v721_v22 }
 0x214   : > { %760 = vst [vmem:[%s1448_s8 + $0x28] sm:$0xff] %v752_v23  ;;  %v753_v26 = vmul.f32 1.4142135, %v745_v24 }
 0x215   : > { %v746_v27 = vsel %vm730_vm9, %v721_v22, %v738_v25 }
 0x216   : > { %761 = vst [vmem:[%s1448_s8 + $0x30] sm:$0xff] %v753_v26  ;;  %v754_v28 = vmul.f32 1.4142135, %v746_v27 }
 0x218   : > { %762 = vst [vmem:[%s1448_s8 + $0x38] sm:$0xff] %v754_v28 }
 0x219   : > { %1184 = shalt.err (!%p1181_p2)
}
 0x21a   : > { %s1185_s13 = scalar_lea.hbm %s1461_s29, 1024  ;;  %s1189_s25 = scalar_lea.hbm %s1517_s4, 2048 }
 0x21b   : > { %p1186_p9 = scmp.ne.s32.totalorder %s1461_s29, %s1185_s13  ;;  %p1190_p0 = scmp.lt.s32.totalorder %s1461_s29, %s1517_s4 }
 0x21c   : > { %p1191_p7 = scmp.lt.s32.totalorder %s1189_s25, %s1185_s13 }
 0x21d   : > { %p1187_p12 = pnand %p1186_p9, %p1391_p3 }
 0x21e   : > { %p1192_p5 = por %p1191_p7, %p1190_p0 }
 0x21f   : > { %p1188_p13 = pneg %p1187_p12 }
 0x221   : > { %p1193_p1 = pnand %p1192_p5, %p1188_p13 }
 0x223   : > { %1196 = shalt.err (!%p1193_p1)
}
 0x224   : > { %s1266_s14 = smov 256   ;;  %s1267_s24 = smov 16  }
 0x225   : > { %972 = dma.vmem_to_hbm [thread:$0]  (%p1391_p3), %s1463_s22, 1024, %s1461_s29, %s764_s18, %s1266_s14, %s1266_s14, %s1267_s24  }
 0x226 PF: > { %s795_s30 = sand.u32 1, %s1235_s15   ;;  %p1530_p4 = scmp.ne.s32.totalorder %s1523_s26, 0 }
 0x227   : > { %p1531_p6 = scmp.ge.s32.totalorder %s1255_s20, 2  ;;  %s796_s10 = scalar_lea.sflag [#allocation5], %s795_s30 }
 0x229   : > { %p986_p8 = pnand %p1531_p6, %p1530_p4 }
 0x22b   : > { %p987_p10 = pneg %p986_p8 }
 0x22d   : > { %1230 = dma.done.wait (%p987_p10), %s796_s10, 1024  }
 0x22e   : > { %1232 = vsyncadd (%p987_p10), %s796_s10, 4294966272  ;;  %s21_s20 = sadd.s32 1, %s1255_s20   ;;  %s1532_s15 = smov %s1239_s16 }
 0x22f   : > { %p18_p11 = scmp.ge.s32.totalorder %s21_s20, 4   ;;  %s1533_s16 = smov %s1243_s17 }
 0x230   : > { %s1534_s17 = smov %s1400_s11  ;;  %s1535_s18 = smov %s1251_s19 }
 0x231   : > { %s1536_s19 = smov %s1538_s28  ;;  %20 = sbr.rel (!%p18_p11) target bundleno = 7 (0x7), region = 96 }
 0x236   :  { %801 = vsyncpa [#allocation4], 1 }
 0x237   :  { %803 = vsyncpa [#allocation4 + $0x1], 1 }
 0x238   :  { %804 = vsyncpa [#allocation7], 1 }
 0x239   :  { %805 = vsyncpa [#allocation5], 1 }
 0x23a   :  { %807 = vsyncpa [#allocation5 + $0x1], 1 }

</bundles_post_ra>
